<compile_context>
chip_gen: v6e
topology: v6e:2x2x1
jax: 0.10.0
libtpu: 0.0.40
codegen_flags: <defaults>
</compile_context>

<pallas_src>
import functools

import jax
import jax.numpy as jnp
from jax.experimental import pallas as pl
from jax.experimental.pallas import tpu as pltpu


def _round_up(a, m):
    return (a + m - 1) // m * m


# ---------------------------------------------------------------------------
# Fused kernel: the whole MFLP stack in one invocation (transposed layout).
#   xt_ref:     (d_in, TB)            input tile, batch on lanes
#   packed_ref: (basis_pad, ncols)    per-layer parameter columns:
#       layer 0:   cols [0..d_in-1] = W_s^T rows (one per input feature)
#                  col d_in   = b_s
#                  col d_in+1 = R      (amplitude, 0 in padded rows)
#                  col d_in+2 = phi    (phase)
#                  col d_in+3 = b_m
#       layer l>=1 (base = d_in+4+5*(l-1)):
#                  base+0 = colsum(W_s^T)   (shared-input-column collapse)
#                  base+1 = b_s, base+2 = R, base+3 = phi, base+4 = b_m
#   out_ref:    (1, TB)               shared-Fmap scalar of the final layer
# ---------------------------------------------------------------------------
def _mflp_kernel(xt_ref, packed_ref, out_ref, *, num_layers, d_in, ifrelu):
    p = packed_ref[...].astype(jnp.float32)        # tiny (basis_pad, ncols)
    x = xt_ref[...].astype(jnp.float32)            # (d_in, TB)

    # ----- layer 0: d_in unrolled VPU broadcast FMAs (no MXU) -----
    s = p[:, d_in:d_in + 1]                        # b_s column, (basis_pad, 1)
    for k in range(d_in):
        s = s + p[:, k:k + 1] * x[k:k + 1, :]      # (basis_pad, TB)
    # wm_sin*sin(s) + wm_cos*cos(s) == R * sin(s + phi); padded rows have R == 0.
    t = (jnp.sum(p[:, d_in + 1:d_in + 2] * jnp.sin(s + p[:, d_in + 2:d_in + 3]),
                 axis=0, keepdims=True)
         + p[0:1, d_in + 3:d_in + 4])              # (1, TB)

    # ----- layers 1..L-1: all input columns equal relu(t) (shared Fmap), so the
    #       hidden projection collapses to a broadcast multiply-add on the VPU.
    for l in range(1, num_layers):
        if ifrelu:
            t = jnp.maximum(t, 0.0)                # ReLU on scalar == ReLU after broadcast
        c = d_in + 4 + 5 * (l - 1)
        s = t * p[:, c:c + 1] + p[:, c + 1:c + 2]  # (basis_pad, TB)
        t = (jnp.sum(p[:, c + 2:c + 3] * jnp.sin(s + p[:, c + 3:c + 4]),
                     axis=0, keepdims=True)
             + p[0:1, c + 4:c + 5])

    out_ref[...] = t.astype(out_ref.dtype)         # lane-dense (1, TB) store


# ---------------------------------------------------------------------------
# Wrapper: batch tiling + single pallas_call + final broadcast.
# ---------------------------------------------------------------------------
def mflp_forward(x, fused, ifrelu, *, batch_tile=32768):
    packed = fused["packed"]
    num_layers = fused["num_layers"]
    out_dim_last = fused["out_dim_last"]

    B, d_in = x.shape
    assert batch_tile % 128 == 0, "batch_tile must be a multiple of 128 (lane dim)"

    if B <= 1024:
        # Tiny batch: one exact tile (block == full extent), no padding.
        tb, num_tiles, b_pad = B, 1, B
    else:
        # At least 2 grid tiles so the "parallel" axis can shard across v7x's 2 TCs;
        # lane-dim tile must be a multiple of 128.
        tb = min(batch_tile, _round_up(pl.cdiv(B, 2), 128))
        num_tiles = pl.cdiv(B, tb)
        b_pad = num_tiles * tb

    # Batch onto lanes. The transpose (and any tail pad) is a single small layout
    # copy fused by XLA; callers that can supply x already as (d_in, B) avoid it.
    xt = x.T                                       # (d_in, B)
    if b_pad != B:
        xt = jnp.pad(xt, ((0, 0), (0, b_pad - B)))

    kernel = functools.partial(_mflp_kernel, num_layers=num_layers,
                               d_in=d_in, ifrelu=bool(ifrelu))

    t = pl.pallas_call(
        kernel,
        out_shape=jax.ShapeDtypeStruct((1, b_pad), x.dtype),
        grid=(num_tiles,),
        in_specs=[
            pl.BlockSpec((d_in, tb), lambda i: (0, i)),      # lane-dense input DMA
            pl.BlockSpec(packed.shape, lambda i: (0, 0)),    # tiny params, resident
        ],
        out_specs=pl.BlockSpec((1, tb), lambda i: (0, i)),   # lane-dense output
        compiler_params=pltpu.CompilerParams(
            dimension_semantics=("parallel",),               # shard batch tiles on v7x
            vmem_limit_bytes=48 * 1024 * 1024),              # safe on v5e/v6e/v7x
    )(xt, packed)

    # All out_dim Fmap instances share parameters -> the layer output is a broadcast
    # of the (B,) scalar row; do it outside the kernel so the kernel never stores
    # out_dim identical copies.
    return jnp.broadcast_to(t[0, :B][:, None], (B, out_dim_last))


# ---------------------------------------------------------------------------
# Parameter construction (deterministic, PyTorch-Linear-style uniform init)
# and packing into the fused kernel layout.
# ---------------------------------------------------------------------------
def init_mflp_params(key, dim_list, basis_list):
    """One parameter set per Flinear layer (its single shared Fmap)."""
    params = []
    for d_in, d_out, basis in zip(dim_list[:-1], dim_list[1:], basis_list):
        k1, k2, k3, k4, key = jax.random.split(key, 5)
        lim_s = 1.0 / jnp.sqrt(jnp.float32(d_in))
        lim_m = 1.0 / jnp.sqrt(jnp.float32(2 * basis))
        params.append(dict(
            ws_t=jax.random.uniform(k1, (d_in, basis), jnp.float32, -lim_s, lim_s),
            bs=jax.random.uniform(k2, (1, basis), jnp.float32, -lim_s, lim_s),
            wm_t=jax.random.uniform(k3, (2 * basis, 1), jnp.float32, -lim_m, lim_m),
            bm=jax.random.uniform(k4, (1, 1), jnp.float32, -lim_m, lim_m),
            out_dim=d_out,
        ))
    return params


def fuse_mflp_params(params, basis_list):
    """Pack all per-layer vectors as columns of one (basis_pad, ncols) array."""
    num_layers = len(params)
    d_in0 = params[0]["ws_t"].shape[0]
    bp = max(8, _round_up(max(basis_list), 8))     # sublane-aligned basis padding

    def pad_b(v, b):
        return jnp.pad(v, (0, bp - b))

    def amp_phase(p, b):
        wm_sin = p["wm_t"][:b, 0]
        wm_cos = p["wm_t"][b:, 0]
        r = jnp.sqrt(wm_sin * wm_sin + wm_cos * wm_cos)
        phi = jnp.arctan2(wm_cos, wm_sin)
        return pad_b(r, b), pad_b(phi, b)          # padded rows: R = 0 -> contribute 0

    cols = []
    # layer 0
    p0, b0 = params[0], basis_list[0]
    for k in range(d_in0):
        cols.append(pad_b(p0["ws_t"][k, :], b0))
    cols.append(pad_b(p0["bs"][0], b0))
    r0, phi0 = amp_phase(p0, b0)
    cols.append(r0)
    cols.append(phi0)
    cols.append(jnp.full((bp,), p0["bm"][0, 0], jnp.float32))
    # layers >= 1
    for l in range(1, num_layers):
        p, b = params[l], basis_list[l]
        cols.append(pad_b(jnp.sum(p["ws_t"], axis=0), b))   # shared-column collapse
        cols.append(pad_b(p["bs"][0], b))
        r, phi = amp_phase(p, b)
        cols.append(r)
        cols.append(phi)
        cols.append(jnp.full((bp,), p["bm"][0, 0], jnp.float32))

    return dict(
        packed=jnp.stack(cols, axis=1),            # (basis_pad, ncols)
        num_layers=num_layers,
        out_dim_last=params[-1]["out_dim"],
    )


# Pure-JAX reference that follows the PyTorch module literally (unfused math).
def mflp_reference(x, params, ifrelu):
    n = len(params)
    for li, p in enumerate(params):
        s = x @ p["ws_t"] + p["bs"]
        z = jnp.concatenate([jnp.sin(s), jnp.cos(s)], axis=-1)
        t = z @ p["wm_t"] + p["bm"]
        x = jnp.broadcast_to(t, (x.shape[0], p["out_dim"]))
        if ifrelu and (li < n - 1):
            x = jnp.maximum(x, 0.0)
    return x


if __name__ == "__main__":
    # MFLP(dim_list=[4, 8, 3], basis_list=[7, 5], ifrelu=True)
    dim_list = [4, 8, 3]
    basis_list = [7, 5]
    ifrelu = True
    batch = 2

    key = jax.random.PRNGKey(0)
    kx, kp = jax.random.split(key)
    x = jax.random.normal(kx, (batch, dim_list[0]), jnp.float32)
    params = init_mflp_params(kp, dim_list, basis_list)
    fused = fuse_mflp_params(params, basis_list)

    out = mflp_forward(x, fused, ifrelu)
    out = jax.block_until_ready(out)

    ref = mflp_reference(x, params, ifrelu)
    assert out.shape == (batch, dim_list[-1]), out.shape
    assert jnp.allclose(out, ref, atol=1e-4, rtol=1e-4), (out, ref)

    print("KERNEL_OK")
</pallas_src>

<mosaic_0001>
module attributes {stable_mosaic.version = 11 : i64} {
  func.func @_mflp_kernel(%arg0: i32, %arg1: memref<4x2xf32, #tpu.memory_space<vmem>>, %arg2: memref<8x13xf32, #tpu.memory_space<vmem>>, %arg3: memref<1x2xf32, #tpu.memory_space<vmem>>) attributes {dimension_semantics = [#tpu.dimension_semantics<parallel>], iteration_bounds = array<i64: 1>, scalar_prefetch = 0 : i64, scratch_operands = 0 : i64, tpu.core_type = #tpu.core_type<tc>, window_params = [{transform_indices = @transform_0, window_bounds = array<i64: 4, 2>}, {pipeline_mode = #tpu.pipeline_mode<synchronous>, transform_indices = @transform_1, window_bounds = array<i64: 8, 13>}, {transform_indices = @transform_2, window_bounds = array<i64: 1, 2>}]} {
    %c0 = arith.constant 0 : index
    %c0_0 = arith.constant 0 : index
    %0 = vector.load %arg2[%c0, %c0_0] : memref<8x13xf32, #tpu.memory_space<vmem>>, vector<8x13xf32>
    %c0_1 = arith.constant 0 : index
    %c0_2 = arith.constant 0 : index
    %1 = vector.load %arg1[%c0_1, %c0_2] : memref<4x2xf32, #tpu.memory_space<vmem>>, vector<4x2xf32>
    %2 = vector.extract_strided_slice %0 {offsets = [0, 4], sizes = [8, 1], strides = [1, 1]} : vector<8x13xf32> to vector<8x1xf32>
    %3 = vector.extract_strided_slice %0 {offsets = [0, 0], sizes = [8, 1], strides = [1, 1]} : vector<8x13xf32> to vector<8x1xf32>
    %4 = vector.extract_strided_slice %1 {offsets = [0, 0], sizes = [1, 2], strides = [1, 1]} : vector<4x2xf32> to vector<1x2xf32>
    %5 = vector.broadcast %3 : vector<8x1xf32> to vector<8x2xf32>
    %6 = vector.broadcast %4 : vector<1x2xf32> to vector<8x2xf32>
    %7 = arith.mulf %5, %6 : vector<8x2xf32>
    %8 = vector.broadcast %2 : vector<8x1xf32> to vector<8x2xf32>
    %9 = arith.addf %8, %7 : vector<8x2xf32>
    %10 = vector.extract_strided_slice %0 {offsets = [0, 1], sizes = [8, 1], strides = [1, 1]} : vector<8x13xf32> to vector<8x1xf32>
    %11 = vector.extract_strided_slice %1 {offsets = [1, 0], sizes = [1, 2], strides = [1, 1]} : vector<4x2xf32> to vector<1x2xf32>
    %12 = vector.broadcast %10 : vector<8x1xf32> to vector<8x2xf32>
    %13 = vector.broadcast %11 : vector<1x2xf32> to vector<8x2xf32>
    %14 = arith.mulf %12, %13 : vector<8x2xf32>
    %15 = arith.addf %9, %14 : vector<8x2xf32>
    %16 = vector.extract_strided_slice %0 {offsets = [0, 2], sizes = [8, 1], strides = [1, 1]} : vector<8x13xf32> to vector<8x1xf32>
    %17 = vector.extract_strided_slice %1 {offsets = [2, 0], sizes = [1, 2], strides = [1, 1]} : vector<4x2xf32> to vector<1x2xf32>
    %18 = vector.broadcast %16 : vector<8x1xf32> to vector<8x2xf32>
    %19 = vector.broadcast %17 : vector<1x2xf32> to vector<8x2xf32>
    %20 = arith.mulf %18, %19 : vector<8x2xf32>
    %21 = arith.addf %15, %20 : vector<8x2xf32>
    %22 = vector.extract_strided_slice %0 {offsets = [0, 3], sizes = [8, 1], strides = [1, 1]} : vector<8x13xf32> to vector<8x1xf32>
    %23 = vector.extract_strided_slice %1 {offsets = [3, 0], sizes = [1, 2], strides = [1, 1]} : vector<4x2xf32> to vector<1x2xf32>
    %24 = vector.broadcast %22 : vector<8x1xf32> to vector<8x2xf32>
    %25 = vector.broadcast %23 : vector<1x2xf32> to vector<8x2xf32>
    %26 = arith.mulf %24, %25 : vector<8x2xf32>
    %27 = arith.addf %21, %26 : vector<8x2xf32>
    %28 = vector.extract_strided_slice %0 {offsets = [0, 5], sizes = [8, 1], strides = [1, 1]} : vector<8x13xf32> to vector<8x1xf32>
    %29 = vector.extract_strided_slice %0 {offsets = [0, 6], sizes = [8, 1], strides = [1, 1]} : vector<8x13xf32> to vector<8x1xf32>
    %30 = vector.broadcast %29 : vector<8x1xf32> to vector<8x2xf32>
    %31 = arith.addf %27, %30 : vector<8x2xf32>
    %32 = math.sin %31 : vector<8x2xf32>
    %33 = vector.broadcast %28 : vector<8x1xf32> to vector<8x2xf32>
    %34 = arith.mulf %33, %32 : vector<8x2xf32>
    %cst = arith.constant dense<0.000000e+00> : vector<2xf32>
    %35 = vector.multi_reduction <add>, %34, %cst [0] : vector<8x2xf32> to vector<2xf32>
    %36 = vector.shape_cast %35 : vector<2xf32> to vector<1x2xf32>
    %37 = vector.extract_strided_slice %0 {offsets = [0, 7], sizes = [1, 1], strides = [1, 1]} : vector<8x13xf32> to vector<1x1xf32>
    %38 = vector.broadcast %37 : vector<1x1xf32> to vector<1x2xf32>
    %39 = arith.addf %36, %38 : vector<1x2xf32>
    %cst_3 = arith.constant 0.000000e+00 : f32
    %40 = vector.broadcast %cst_3 : f32 to vector<1x2xf32>
    %41 = arith.maximumf %39, %40 : vector<1x2xf32>
    %42 = vector.extract_strided_slice %0 {offsets = [0, 8], sizes = [8, 1], strides = [1, 1]} : vector<8x13xf32> to vector<8x1xf32>
    %43 = vector.broadcast %41 : vector<1x2xf32> to vector<8x2xf32>
    %44 = vector.broadcast %42 : vector<8x1xf32> to vector<8x2xf32>
    %45 = arith.mulf %43, %44 : vector<8x2xf32>
    %46 = vector.extract_strided_slice %0 {offsets = [0, 9], sizes = [8, 1], strides = [1, 1]} : vector<8x13xf32> to vector<8x1xf32>
    %47 = vector.broadcast %46 : vector<8x1xf32> to vector<8x2xf32>
    %48 = arith.addf %45, %47 : vector<8x2xf32>
    %49 = vector.extract_strided_slice %0 {offsets = [0, 10], sizes = [8, 1], strides = [1, 1]} : vector<8x13xf32> to vector<8x1xf32>
    %50 = vector.extract_strided_slice %0 {offsets = [0, 11], sizes = [8, 1], strides = [1, 1]} : vector<8x13xf32> to vector<8x1xf32>
    %51 = vector.broadcast %50 : vector<8x1xf32> to vector<8x2xf32>
    %52 = arith.addf %48, %51 : vector<8x2xf32>
    %53 = math.sin %52 : vector<8x2xf32>
    %54 = vector.broadcast %49 : vector<8x1xf32> to vector<8x2xf32>
    %55 = arith.mulf %54, %53 : vector<8x2xf32>
    %cst_4 = arith.constant dense<0.000000e+00> : vector<2xf32>
    %56 = vector.multi_reduction <add>, %55, %cst_4 [0] : vector<8x2xf32> to vector<2xf32>
    %57 = vector.shape_cast %56 : vector<2xf32> to vector<1x2xf32>
    %58 = vector.extract_strided_slice %0 {offsets = [0, 12], sizes = [1, 1], strides = [1, 1]} : vector<8x13xf32> to vector<1x1xf32>
    %59 = vector.broadcast %58 : vector<1x1xf32> to vector<1x2xf32>
    %60 = arith.addf %57, %59 : vector<1x2xf32>
    %c0_5 = arith.constant 0 : index
    %c0_6 = arith.constant 0 : index
    %61 = vector.load %arg3[%c0_5, %c0_6] : memref<1x2xf32, #tpu.memory_space<vmem>>, vector<1x2xf32>
    tpu.vector_store %arg3[%c0_5, %c0_6], %60 {strides = array<i32>} : memref<1x2xf32, #tpu.memory_space<vmem>>, vector<1x2xf32>,
    return
  }
  func.func @transform_0(%arg0: i32) -> (i32, i32) {
    %c0_i32 = arith.constant 0 : i32
    %c0_i32_0 = arith.constant 0 : i32
    return %c0_i32, %arg0 : i32, i32
  }
  func.func @transform_1(%arg0: i32) -> (i32, i32) {
    %c0_i32 = arith.constant 0 : i32
    %c0_i32_0 = arith.constant 0 : i32
    %c0_i32_1 = arith.constant 0 : i32
    return %c0_i32, %c0_i32_0 : i32, i32
  }
  func.func @transform_2(%arg0: i32) -> (i32, i32) {
    %c0_i32 = arith.constant 0 : i32
    %c0_i32_0 = arith.constant 0 : i32
    return %c0_i32, %arg0 : i32, i32
  }
}

</mosaic_0001>

<bundles_post_ra>
// kernel: tpu_custom_call.1
= control target key start
LH: loop header
LB: loop body
LE: loop exit
PB: predicated region body
PF: predicated region fallthrough
CT: control target
= control target key end

     0   :  { %7 = vsyncpa [#allocation3], 0  ;;  %s580_s0 = inlined_call_operand.vmem [shape: f32[4,2], index: 0, kind: input, shape index: {}]   ;;  %s581_s1 = inlined_call_operand.hbm [shape: f32[8,13], index: 1, kind: input, shape index: {}]   ;;  %s582_s2 = inlined_call_operand.hbm [shape: f32[1,2], index: 2, kind: output, shape index: {}]  }
   0x1   :  { %8 = vsyncpa [#allocation4], 0  ;;  %s459_s9 = smov [#allocation2]  }
   0x2   :  { %s17_s10 = sshll.u32 %s459_s9, 4  ;;  %s18_s10 = int_to_ptr.vmem [resolvable:$true] %s17_s10 }
   0x3   :  { %s423_s11 = scalar_lea.vmem %s18_s10, 128  ;;  %p428_p1 = scmp.lt.s32.totalorder %s18_s10, %s18_s10 }
   0x4   :  { %p424_p0 = scmp.ne.s32.totalorder %s18_s10, %s423_s11  ;;  %p429_p2 = scmp.lt.s32.totalorder %s423_s11, %s423_s11 }
   0x6   :  { %p430_p3 = por %p429_p2, %p428_p1 }
   0x8   :  { %p431_p4 = pnand %p430_p3, %p424_p0 }
   0xa   :  { %434 = shalt.err (!%p431_p4)
}
   0xb   :  { %20 = dma.hbm_to_vmem [thread:$0]  %s581_s1, 128, %s18_s10, [#allocation3]  }
   0xc   :  { %455 = dma.done.wait [#allocation3], 128  }
   0xd   :  { %456 = vsyncadd [#allocation3], 4294967168  ;;  %v460_v0 = vmov 1   ;;  %v461_v1 = vmov 0   ;;  %v24_v2 = vld [vmem:[#allocation2] sm:$0xff]  ;;  %v462_v3 = vmov 2   ;;  %v31_v14 = vlaneseq }
   0xe   :  { %395 = vset.pattern.permute.xlu1 %v460_v0  ;;  %393 = vset.pattern.permute.xlu0 %v461_v1  ;;  %v463_v4 = vmov 4   ;;  %v464_v5 = vmov 3   ;;  %v465_v6 = vmov 6   ;;  %v466_v7 = vmov 5   ;;  %v25_v17 = vld [vmem:[%s580_s0] sm:$0xf] }
   0xf   :  { %42 = vperm.xlu1 %395, %v24_v2   ;;  %28 = vperm.xlu0 %393, %v24_v2   ;;  %v467_v8 = vmov 8   ;;  %v468_v9 = vmov 7   ;;  %v469_v10 = vmov 9   ;;  %v470_v11 = vmov 11   ;;  %s479_s0 = smov [#allocation5]  }
  0x10   :  { %v471_v12 = vmov 10   ;;  %v472_v13 = vmov 12   ;;  %v498_v15 = vshrl.u32 %v31_v14, 7  ;;  %v473_v50 = vmov 683565275   ;;  %s347_s15 = sshll.u32 %s479_s0, 4  ;;  %s348_s15 = int_to_ptr.vmem [resolvable:$true] %s347_s15 }
  0x11   :  { %v474_v52 = vmov 2475754826   ;;  %v475_v55 = vmov 2131351028   ;;  %v476_v58 = vmov 2102212464   ;;  %p440_p6 = scmp.lt.s32.totalorder %s348_s15, %s348_s15 }
  0x12   :  { %v33_v16 = vsub.s32 0, %v498_v15  ;;  %v47_v18 = vsub.s32 1, %v498_v15  ;;  %v57_v22 = vsub.s32 2, %v498_v15  ;;  %v67_v24 = vsub.s32 3, %v498_v15  ;;  %s435_s16 = scalar_lea.vmem %s348_s15, 16  ;;  %s439_s17 = scalar_lea.vmem %s348_s15, 32 }
  0x13   :  { %396 = vset.pattern.permute.xlu1 %v462_v3  ;;  %394 = vset.pattern.permute.xlu0 %v463_v4  ;;  %v477_v61 = vmov 920167782   ;;  %v478_v0 = vmov 1326507024   ;;  %vm185_vm13 = vcmask 15360   ;;  %p436_p5 = scmp.ne.s32.totalorder %s348_s15, %s435_s16  ;;  %p441_p7 = scmp.lt.s32.totalorder %s439_s17, %s435_s16 }
  0x14   :  { %52 = vperm.xlu1 %396, %v24_v2   ;;  %37 = vperm.xlu0 %394, %v24_v2   ;;  %v34_v20 = vrot.slane %v25_v17, %v33_v16  ;;  %v48_v23 = vrot.slane %v25_v17, %v47_v18  ;;  %v58_v26 = vrot.slane %v25_v17, %v57_v22 }
  0x15   :  { %v68_v31 = vrot.slane %v25_v17, %v67_v24  ;;  %p442_p8 = por %p441_p7, %p440_p6 }
  0x17   :  { %p443_p9 = pnand %p442_p8, %p436_p5 }
  0x18   :  { %397 = vset.pattern.permute.xlu1 %v464_v5  ;;  %398 = vset.pattern.permute.xlu0 %v465_v6 }
  0x19   :  { %62 = vperm.xlu1 %397, %v24_v2   ;;  %72 = vperm.xlu0 %398, %v24_v2  }
  0x1d   :  { %399 = vset.pattern.permute.xlu1 %v466_v7  ;;  %401 = vset.pattern.permute.xlu0 %v467_v8 }
  0x1e   :  { %181 = vperm.xlu1 %399, %v24_v2   ;;  %204 = vperm.xlu0 %401, %v24_v2  }
  0x22   :  { %400 = vset.pattern.permute.xlu1 %v468_v9  ;;  %404 = vset.pattern.permute.xlu0 %v471_v12 }
  0x23   :  { %194 = vperm.xlu1 %400, %v24_v2   ;;  %323 = vperm.xlu0 %404, %v24_v2  }
  0x27   :  { %402 = vset.pattern.permute.xlu1 %v469_v10  ;;  %406 = vset.pattern.permute.xlu0 %v472_v13 }
  0x28   :  { %209 = vperm.xlu1 %402, %v24_v2  }
  0x2c   :  { %403 = vset.pattern.permute.xlu1 %v470_v11 }
  0x2d   :  { %214 = vperm.xlu1 %403, %v24_v2  }
  0x31   :  { %405 = vset.pattern.permute.xlu1 %v472_v13 }
  0x32   :  { %335 = vperm.xlu1 %405, %v24_v2  }
  0x8a   :  { %v43_v19 = vpop.permute.xlu1 %42  ;;  %v29_v21 = vpop.permute.xlu0 %28 }
  0x8b   :  { %v35_v25 = vmul.f32 %v34_v20, %v29_v21  ;;  %v49_v29 = vmul.f32 %v48_v23, %v43_v19 }
  0x8f   :  { %v53_v27 = vpop.permute.xlu1 %52  ;;  %v38_v28 = vpop.permute.xlu0 %37 }
  0x90   :  { %v40_v30 = vadd.f32 %v38_v28, %v35_v25  ;;  %v59_v32 = vmul.f32 %v58_v26, %v53_v27 }
  0x92   :  { %v50_v33 = vadd.f32 %v49_v29, %v40_v30 }
  0x94   :  { %v63_v34 = vpop.permute.xlu1 %62  ;;  %v60_v35 = vadd.f32 %v59_v32, %v50_v33  ;;  %v73_v37 = vpop.permute.xlu0 %72 }
  0x95   :  { %v69_v36 = vmul.f32 %v68_v31, %v63_v34 }
  0x97   :  { %v70_v38 = vadd.f32 %v69_v36, %v60_v35 }
  0x99   :  { %v509_v39 = vadd.f32 %v73_v37, %v70_v38 }
  0x9b   :  { %v79_v40 = vand.u32 2139095040, %v509_v39  ;;  %v76_v44 = vand.u32 2147483647, %v509_v39  ;;  %vm78_vm7 = vcmp.lt.s32.totalorder %v509_v39, 0  ;;  %vm168_vm12 = vweird.f32 %v509_v39 }
  0x9d   :  { %v80_v41 = vshrl.u32 %v79_v40, 23  ;;  %v83_v47 = vand.u32 8388607, %v76_v44  ;;  %vm77_vm8 = vcmp.le.f32.partialorder %v76_v44, 0.7853982 }
  0x9f   :  { %v356_v42 = vadd.s32 4294967169, %v80_v41  ;;  %v84_v2 = vor.u32 8388608, %v83_v47 }
  0xa1   :  { %v86_v43 = vadd.s32 1, %v356_v42  ;;  %v124_v18 = vshll.u32 %v84_v2, 8 }
  0xa3   :  { %vm87_vm0 = vcmp.gt.s32.totalorder %v86_v43, 0 }
  0xa4   :  { %v88_v45 = vsel %vm87_vm0, %v86_v43, 0 }
  0xa5   :  { %v90_v46 = vand.u32 31, %v88_v45  ;;  %v89_v49 = vshrl.u32 %v88_v45, 5 }
  0xa7   :  { %v91_v48 = vsub.s32 32, %v90_v46  ;;  %v93_v51 = vshll.u32 %v473_v50, %v90_v46  ;;  %v96_v53 = vshll.u32 %v474_v52, %v90_v46  ;;  %v99_v57 = vshll.u32 %v475_v55, %v90_v46 }
  0xa8   :  { %v102_v60 = vshll.u32 %v476_v58, %v90_v46  ;;  %v105_v63 = vshll.u32 %v477_v61, %v90_v46  ;;  %vm108_vm1 = vcmp.lt.s32.totalorder %v89_v49, 1  ;;  %vm111_vm2 = vcmp.lt.s32.totalorder %v89_v49, 4 }
  0xa9   :  { %v94_v54 = vshrl.u32 %v474_v52, %v91_v48  ;;  %v97_v56 = vshrl.u32 %v475_v55, %v91_v48  ;;  %v100_v59 = vshrl.u32 %v476_v58, %v91_v48  ;;  %v103_v62 = vshrl.u32 %v477_v61, %v91_v48 }
  0xaa   :  { %v106_v1 = vshrl.u32 %v478_v0, %v91_v48  ;;  %v92_v11 = vshrl.u32 %v473_v50, %v91_v48  ;;  %vm110_vm3 = vcmp.lt.s32.totalorder %v89_v49, 3  ;;  %vm109_vm4 = vcmp.lt.s32.totalorder %v89_v49, 2 }
  0xab   :  { %v95_v3 = vor.u32 %v94_v54, %v93_v51  ;;  %v98_v4 = vor.u32 %v97_v56, %v96_v53  ;;  %v101_v5 = vor.u32 %v100_v59, %v99_v57  ;;  %v104_v6 = vor.u32 %v103_v62, %v102_v60 }
  0xac   :  { %v107_v7 = vor.u32 %v106_v1, %v105_v63 }
  0xad   :  { %v113_v8 = vsel %vm111_vm2, %v101_v5, 2102212464  ;;  %v116_v9 = vsel %vm108_vm1, %v95_v3, %v98_v4  ;;  %v120_v10 = vsel %vm108_vm1, %v98_v4, %v101_v5  ;;  %v117_v12 = vsel %vm111_vm2, %v104_v6, 920167782 }
  0xae   :  { %v121_v13 = vsel %vm111_vm2, %v107_v7, 1326507024  ;;  %v118_v14 = vsel %vm110_vm3, %v101_v5, %v117_v12  ;;  %v112_v19 = vsel %vm108_vm1, %v92_v11, %v95_v3  ;;  %v114_v20 = vsel %vm110_vm3, %v98_v4, %v113_v8 }
  0xaf   :  { %v122_v17 = vsel %vm110_vm3, %v104_v6, %v121_v13  ;;  %v119_v21 = vsel %vm109_vm4, %v116_v9, %v118_v14  ;;  %v115_v27 = vsel %vm109_vm4, %v112_v19, %v114_v20 }
  0xb0   :  { %v123_v22 = vsel %vm109_vm4, %v120_v10, %v122_v17  ;;  %v529_v25 = vmul.u32.u64.low %v124_v18, %v119_v21  ;;  %v530_v26 = vmul.u32.u64.high %v124_v18, %v119_v21, %v529_v25  ;;  %v131_v29 = vmul.u32 %v124_v18, %v115_v27  ;;  %v182_v10 = vpop.permute.xlu1 %181  ;;  %v205_v27 = vpop.permute.xlu0 %204 }
  0xb1   :  { %v526_v23 = vmul.u32.u64.low %v124_v18, %v123_v22  ;;  %v527_v24 = vmul.u32.u64.high %v124_v18, %v123_v22, %v526_v23 }
  0xb2   :  { %v134_v28 = vadd.s32 1, %v530_v26 }
  0xb3   :  { %vm133_vm5 = vc.u32 %v527_v24, %v529_v25  ;;  %v132_v42 = vadd.s32 %v529_v25, %v527_v24 }
  0xb4   :  { %v135_v30 = vsel %vm133_vm5, %v134_v28, %v530_v26  ;;  %v195_v21 = vpop.permute.xlu1 %194 }
  0xb5   :  { %v136_v31 = vadd.s32 %v135_v30, %v131_v29 }
  0xb7   :  { %v137_v32 = vadd.s32 536870912, %v136_v31 }
  0xb8   :  { %v210_v25 = vpop.permute.xlu1 %209 }
  0xb9   :  { %v138_v33 = vshrl.u32 %v137_v32, 30 }
  0xbb   :  { %v139_v34 = vshll.u32 %v138_v33, 30  ;;  %v162_v60 = vsub.s32 4, %v138_v33 }
  0xbc   :  { %v215_v29 = vpop.permute.xlu1 %214 }
  0xbd   :  { %v140_v35 = vsub.s32 %v136_v31, %v139_v34  ;;  %v163_v1 = vsel %vm78_vm7, %v162_v60, %v138_v33 }
  0xbe   :  { %v165_v2 = vsel %vm77_vm8, 0, %v163_v1 }
  0xbf   :  { %v142_v36 = vsub.s32 0, %v140_v35  ;;  %v169_v3 = vadd.s32 3, %v165_v2 }
  0xc1   :  { %v357_v37 = vmin.u32 %v142_v36, %v140_v35  ;;  %v170_v4 = vand.u32 3, %v169_v3 }
  0xc3   :  { %v144_v38 = vclz %v357_v37  ;;  %vm175_vm9 = vcmp.eq.s32.totalorder %v170_v4, 2  ;;  %vm172_vm10 = vcmp.eq.s32.totalorder %v170_v4, 0  ;;  %vm171_vm11 = vcmp.lt.s32.totalorder %v170_v4, 2 }
  0xc5   :  { %v358_v40 = vadd.s32 4294967294, %v144_v38 }
  0xc7   :  { %vm359_vm6 = vcmp.lt.s32.totalorder %v358_v40, 0 }
  0xc8   :  { %v147_v41 = vsel %vm359_vm6, 0, %v358_v40 }
  0xc9   :  { %v148_v43 = vsub.s32 32, %v147_v41  ;;  %v152_v45 = vsub.s32 4294967266, %v147_v41  ;;  %v149_v46 = vshll.u32 %v140_v35, %v147_v41 }
  0xcb   :  { %v150_v47 = vshrl.u32 %v132_v42, %v148_v43  ;;  %v153_v48 = vadd.s32 127, %v152_v45 }
  0xcd   :  { %v151_v49 = vor.u32 %v150_v47, %v149_v46  ;;  %v154_v51 = vshll.u32 %v153_v48, 23 }
  0xcf   :  { %v155_v53 = vor.u32 4788187, %v154_v51  ;;  %v158_v56 = vcvt.s32.f32 %v151_v49 }
  0xd1   :  { %v156_v54 = vand.u32 2147483647, %v155_v53 }
  0xd3   :  { %v159_v57 = vmul.f32 %v158_v56, %v156_v54 }
  0xd5   :  { %v160_v59 = vxor.u32 2147483648, %v159_v57 }
  0xd7   :  { %v161_v62 = vsel %vm78_vm7, %v160_v59, %v159_v57 }
  0xd8   :  { %v164_v63 = vsel %vm77_vm8, %v509_v39, %v161_v62 }
  0xd9   :  { %407 = vcosq.f32 %v164_v63 }
  0xda   :  { %409 = vsinq.f32 %v164_v63 }
  0xe6   :  { %v408_v5 = vpop.eup %407 }
  0xe7   :  { %v410_v6 = vpop.eup %409  ;;  %v176_v7 = vxor.u32 2147483648, %v408_v5 }
  0xe8   :  { %v173_v8 = vxor.u32 2147483648, %v410_v6 }
  0xe9   :  { %v177_v9 = vsel %vm175_vm9, %v176_v7, %v410_v6 }
  0xea   :  { %v174_v11 = vsel %vm172_vm10, %v408_v5, %v173_v8 }
  0xeb   :  { %v178_v44 = vsel %vm171_vm11, %v174_v11, %v177_v9  ;;  %vm339_vm11 = vcmask 8192  }
  0xec   :  { %v179_v12 = vsel %vm168_vm12, nan, %v178_v44 }
  0xed   :  { %v184_v13 = vmul.f32 %v182_v10, %v179_v12 }
  0xef   :  { %v186_v14 = vsel %vm185_vm13, %v184_v13, 0.0 }
  0xf0   :  { %v187_v17 = vrot.slane %v186_v14, 4 }
  0xf2   :  { %v188_v18 = vadd.f32 %v187_v17, %v186_v14 }
  0xf4   :  { %v189_v19 = vrot.slane %v188_v18, 2 }
  0xf6   :  { %v190_v20 = vadd.f32 %v189_v19, %v188_v18 }
  0xf8   :  { %v191_v22 = vrot.slane %v190_v20, 1 }
  0xfa   :  { %v192_v23 = vadd.f32 %v191_v22, %v190_v20 }
  0xfc   :  { %v197_v24 = vadd.f32 %v195_v21, %v192_v23 }
  0xfe   :  { %v198_v26 = vmax.f32 %v197_v24, 0.0 }
 0x100   :  { %v202_v39 = vrot.slane %v198_v26, %v33_v16 }
 0x102   :  { %v207_v28 = vmul.f32 %v205_v27, %v202_v39 }
 0x104   :  { %v212_v30 = vadd.f32 %v210_v25, %v207_v28 }
 0x106   :  { %v544_v31 = vadd.f32 %v215_v29, %v212_v30 }
 0x108   :  { %v221_v32 = vand.u32 2139095040, %v544_v31  ;;  %v218_v33 = vand.u32 2147483647, %v544_v31  ;;  %vm220_vm5 = vcmp.lt.s32.totalorder %v544_v31, 0  ;;  %vm310_vm10 = vweird.f32 %v544_v31 }
 0x10a   :  { %v222_v34 = vshrl.u32 %v221_v32, 23  ;;  %v225_v36 = vand.u32 8388607, %v218_v33  ;;  %vm219_vm6 = vcmp.le.f32.partialorder %v218_v33, 0.7853982 }
 0x10c   :  { %v360_v35 = vadd.s32 4294967169, %v222_v34  ;;  %v226_v40 = vor.u32 8388608, %v225_v36 }
 0x10e   :  { %v228_v37 = vadd.s32 1, %v360_v35  ;;  %v266_v45 = vshll.u32 %v226_v40, 8 }
 0x110   :  { %vm229_vm14 = vcmp.gt.s32.totalorder %v228_v37, 0 }
 0x111   :  { %v230_v38 = vsel %vm229_vm14, %v228_v37, 0 }
 0x112   :  { %v232_v15 = vand.u32 31, %v230_v38  ;;  %v231_v16 = vshrl.u32 %v230_v38, 5 }
 0x114   :  { %v233_v41 = vsub.s32 32, %v232_v15  ;;  %v244_v42 = vshll.u32 %v476_v58, %v232_v15  ;;  %v247_v43 = vshll.u32 %v477_v61, %v232_v15  ;;  %v235_v48 = vshll.u32 %v473_v50, %v232_v15 }
 0x115   :  { %v238_v51 = vshll.u32 %v474_v52, %v232_v15  ;;  %v241_v54 = vshll.u32 %v475_v55, %v232_v15  ;;  %vm253_vm15 = vcmp.lt.s32.totalorder %v231_v16, 4  ;;  %vm250_vm0 = vcmp.lt.s32.totalorder %v231_v16, 1 }
 0x116   :  { %v245_v46 = vshrl.u32 %v477_v61, %v233_v41  ;;  %v248_v47 = vshrl.u32 %v478_v0, %v233_v41  ;;  %v236_v49 = vshrl.u32 %v474_v52, %v233_v41  ;;  %v239_v53 = vshrl.u32 %v475_v55, %v233_v41 }
 0x117   :  { %v242_v56 = vshrl.u32 %v476_v58, %v233_v41  ;;  %v234_v61 = vshrl.u32 %v473_v50, %v233_v41  ;;  %vm251_vm1 = vcmp.lt.s32.totalorder %v231_v16, 2  ;;  %vm252_vm2 = vcmp.lt.s32.totalorder %v231_v16, 3 }
 0x118   :  { %v246_v57 = vor.u32 %v245_v46, %v244_v42  ;;  %v249_v59 = vor.u32 %v248_v47, %v247_v43  ;;  %v237_v60 = vor.u32 %v236_v49, %v235_v48  ;;  %v240_v62 = vor.u32 %v239_v53, %v238_v51 }
 0x119   :  { %v243_v0 = vor.u32 %v242_v56, %v241_v54  ;;  %v324_v56 = vpop.permute.xlu0 %323 }
 0x11a   :  { %v259_v63 = vsel %vm253_vm15, %v246_v57, 920167782  ;;  %v263_v1 = vsel %vm253_vm15, %v249_v59, 1326507024  ;;  %v258_v2 = vsel %vm250_vm0, %v237_v60, %v240_v62  ;;  %v254_v55 = vsel %vm250_vm0, %v234_v61, %v237_v60 }
 0x11b   :  { %v255_v52 = vsel %vm253_vm15, %v243_v0, 2102212464  ;;  %v260_v3 = vsel %vm252_vm2, %v243_v0, %v259_v63  ;;  %v262_v4 = vsel %vm250_vm0, %v240_v62, %v243_v0  ;;  %v264_v6 = vsel %vm252_vm2, %v246_v57, %v263_v1 }
 0x11c   :  { %v256_v5 = vsel %vm252_vm2, %v240_v62, %v255_v52  ;;  %v261_v58 = vsel %vm251_vm1, %v258_v2, %v260_v3  ;;  %v265_v7 = vsel %vm251_vm1, %v262_v4, %v264_v6  ;;  %v336_v52 = vpop.permute.xlu1 %335 }
 0x11d   :  { %v561_v8 = vmul.u32.u64.low %v266_v45, %v261_v58  ;;  %v562_v9 = vmul.u32.u64.high %v266_v45, %v261_v58, %v561_v8  ;;  %v564_v50 = vmul.u32.u64.low %v266_v45, %v265_v7  ;;  %v565_v10 = vmul.u32.u64.high %v266_v45, %v265_v7, %v564_v50 }
 0x11e   :  { %v257_v11 = vsel %vm251_vm1, %v254_v55, %v256_v5 }
 0x11f   :  { %v276_v44 = vadd.s32 1, %v562_v9  ;;  %v273_v12 = vmul.u32 %v266_v45, %v257_v11  ;;  %vm275_vm3 = vc.u32 %v565_v10, %v561_v8  ;;  %v274_v26 = vadd.s32 %v561_v8, %v565_v10 }
 0x121   :  { %v277_v13 = vsel %vm275_vm3, %v276_v44, %v562_v9 }
 0x122   :  { %v278_v14 = vadd.s32 %v277_v13, %v273_v12 }
 0x124   :  { %v279_v17 = vadd.s32 536870912, %v278_v14 }
 0x126   :  { %v280_v18 = vshrl.u32 %v279_v17, 30 }
 0x128   :  { %v281_v19 = vshll.u32 %v280_v18, 30  ;;  %v304_v15 = vsub.s32 4, %v280_v18 }
 0x12a   :  { %v282_v20 = vsub.s32 %v278_v14, %v281_v19  ;;  %v305_v42 = vsel %vm220_vm5, %v304_v15, %v280_v18 }
 0x12b   :  { %v307_v43 = vsel %vm219_vm6, 0, %v305_v42 }
 0x12c   :  { %v284_v21 = vsub.s32 0, %v282_v20  ;;  %v311_v45 = vadd.s32 3, %v307_v43 }
 0x12e   :  { %v361_v22 = vmin.u32 %v284_v21, %v282_v20  ;;  %v312_v46 = vand.u32 3, %v311_v45 }
 0x130   :  { %v286_v23 = vclz %v361_v22  ;;  %vm317_vm7 = vcmp.eq.s32.totalorder %v312_v46, 2  ;;  %vm314_vm8 = vcmp.eq.s32.totalorder %v312_v46, 0  ;;  %vm313_vm9 = vcmp.lt.s32.totalorder %v312_v46, 2 }
 0x132   :  { %v362_v24 = vadd.s32 4294967294, %v286_v23 }
 0x134   :  { %vm363_vm4 = vcmp.lt.s32.totalorder %v362_v24, 0 }
 0x135   :  { %v289_v25 = vsel %vm363_vm4, 0, %v362_v24 }
 0x136   :  { %v290_v27 = vsub.s32 32, %v289_v25  ;;  %v294_v39 = vsub.s32 4294967266, %v289_v25  ;;  %v291_v28 = vshll.u32 %v282_v20, %v289_v25 }
 0x138   :  { %v292_v29 = vshrl.u32 %v274_v26, %v290_v27  ;;  %v295_v30 = vadd.s32 127, %v294_v39 }
 0x13a   :  { %v293_v32 = vor.u32 %v292_v29, %v291_v28  ;;  %v296_v34 = vshll.u32 %v295_v30, 23 }
 0x13c   :  { %v297_v35 = vor.u32 4788187, %v296_v34  ;;  %v300_v37 = vcvt.s32.f32 %v293_v32 }
 0x13e   :  { %v298_v36 = vand.u32 2147483647, %v297_v35 }
 0x140   :  { %v301_v38 = vmul.f32 %v300_v37, %v298_v36 }
 0x142   :  { %v302_v40 = vxor.u32 2147483648, %v301_v38 }
 0x144   :  { %v303_v16 = vsel %vm220_vm5, %v302_v40, %v301_v38 }
 0x145   :  { %v306_v41 = vsel %vm219_vm6, %v544_v31, %v303_v16 }
 0x146   :  { %411 = vcosq.f32 %v306_v41 }
 0x147   :  { %413 = vsinq.f32 %v306_v41 }
 0x153   :  { %v412_v47 = vpop.eup %411 }
 0x154   :  { %v414_v48 = vpop.eup %413  ;;  %v318_v49 = vxor.u32 2147483648, %v412_v47 }
 0x155   :  { %v315_v51 = vxor.u32 2147483648, %v414_v48 }
 0x156   :  { %v319_v53 = vsel %vm317_vm7, %v318_v49, %v414_v48 }
 0x157   :  { %v316_v54 = vsel %vm314_vm8, %v412_v47, %v315_v51 }
 0x158   :  { %v320_v33 = vsel %vm313_vm9, %v316_v54, %v319_v53 }
 0x159   :  { %v321_v57 = vsel %vm310_vm10, nan, %v320_v33 }
 0x15a   :  { %v326_v59 = vmul.f32 %v324_v56, %v321_v57 }
 0x15c   :  { %v327_v60 = vsel %vm185_vm13, %v326_v59, 0.0 }
 0x15d   :  { %v328_v61 = vrot.slane %v327_v60, 4 }
 0x15f   :  { %v329_v62 = vadd.f32 %v328_v61, %v327_v60 }
 0x161   :  { %v330_v0 = vrot.slane %v329_v62, 2 }
 0x163   :  { %v331_v63 = vadd.f32 %v330_v0, %v329_v62 }
 0x165   :  { %v332_v1 = vrot.slane %v331_v63, 1 }
 0x167   :  { %v333_v2 = vadd.f32 %v332_v1, %v331_v63 }
 0x169   :  { %v338_v3 = vadd.f32 %v336_v52, %v333_v2 }
 0x16b   :  { %340 = vst.msk [vmem:[#allocation5] sm:$0x1] %vm339_vm11, %v338_v3 }
 0x16c   :  { %446 = shalt.err (!%p443_p9)
}
 0x16d   :  { %350 = dma.vmem_to_hbm [thread:$0]  %s348_s15, 16, %s582_s2, [#allocation4]  }
 0x16e   :  { %457 = dma.done.wait [#allocation4], 16  }
 0x16f   :  { %458 = vsyncadd [#allocation4], 4294967280 }
 0x170   :  { %354 = vsyncpa [#allocation3], 1 }
 0x171   :  { %355 = vsyncpa [#allocation4], 1 }

</bundles_post_ra>
